<compile_context>
chip_gen: v5e
topology: v5e:2x2
jax: 0.10.0
libtpu: 0.0.40
codegen_flags: <defaults>
</compile_context>

<pallas_src>
import math

import numpy as np
import jax
import jax.numpy as jnp
from jax.experimental import pallas as pl
from jax.experimental.pallas import tpu as pltpu


def _round_up(x: int, m: int) -> int:
    return ((x + m - 1) // m) * m


def _resample_matmul_kernel(x_ref, w_ref, o_ref):
    # x_ref: [TM, Kwin]   rows = flattened (batch, superblock), lanes = window samples
    # w_ref: [Kwin, Nmat] block-Toeplitz unrolled filter bank (constant over the grid)
    # o_ref: [TM, Nmat]   Nmat = SB*new_sr consecutive output samples per row
    o_ref[...] = jnp.dot(
        x_ref[...], w_ref[...], preferred_element_type=jnp.float32
    ).astype(o_ref.dtype)


def _build_filter_bank(old_sr: int, new_sr: int, zeros: int, rolloff: float):
    """Same math as Resample._init_kernels (built in float64 for a clean reference)."""
    sr = min(new_sr, old_sr) * rolloff
    width = int(math.ceil(zeros * old_sr / sr))
    idx = np.arange(-width, width + old_sr, dtype=np.float64)
    rows = []
    for i in range(new_sr):
        t = (-i / new_sr + idx / old_sr) * sr
        t = np.clip(t, -zeros, zeros) * math.pi
        window = np.cos(t / zeros / 2.0) ** 2
        kern = np.sinc(t / math.pi) * window
        rows.append(kern / kern.sum())
    return width, np.stack(rows)  # [new_sr, K]


def make_resample(old_sr: int, new_sr: int, zeros: int = 24, rolloff: float = 0.945):
    """Returns (resample_fn, meta) matching Resample(old_sr, new_sr).forward."""
    if not isinstance(old_sr, int) or not isinstance(new_sr, int):
        raise ValueError("old_sr and new_sr should be integers")
    g = math.gcd(old_sr, new_sr)
    old_sr //= g
    new_sr //= g

    if old_sr == new_sr:
        return (lambda x: x), None

    width, bank64 = _build_filter_bank(old_sr, new_sr, zeros, rolloff)
    K = bank64.shape[-1]  # == 2*width + old_sr

    # --- choose the superblock size SB (output frames folded into one matmul) -------
    # Want SB*new_sr (lane width of one output row) to be a multiple of 128 for
    # unmasked stores, while keeping the per-tile contraction length bounded so the
    # weight + input/output tiles stay small in VMEM on every TPU generation.
    max_ctr = 4096
    sb_cap = max(1, (max_ctr - K) // old_sr + 1)
    sb_min = max(1, min(sb_cap, -(-128 // new_sr)))  # ceil(128 / new_sr)
    SB = sb_min
    for s in range(sb_min, min(sb_cap, max(sb_min, 1024 // new_sr)) + 1):
        if (s * new_sr) % 128 == 0:
            SB = s
            break
    N_mat = SB * new_sr
    Kwin = _round_up((SB - 1) * old_sr + K, 8)  # sublane-aligned contraction length

    # Block-Toeplitz "unrolled polyphase" weight: Wb[g*old_sr + k, g*new_sr + i] = W[i, k]
    Wb_np = np.zeros((Kwin, N_mat), dtype=np.float32)
    bank_T = bank64.T.astype(np.float32)  # [K, new_sr]
    for frm in range(SB):
        Wb_np[frm * old_sr: frm * old_sr + K, frm * new_sr: (frm + 1) * new_sr] = bank_T
    Wb = jnp.asarray(Wb_np)

    def resample(x):
        shape = x.shape
        T = shape[-1]
        xb = jnp.reshape(x, (-1, T)).astype(jnp.float32)  # [B, T]
        B = xb.shape[0]

        # replicate padding, identical to F.pad(..., mode='replicate')
        xpad = jnp.pad(xb, ((0, 0), (width, width + old_sr)), mode="edge")
        P = xpad.shape[-1]
        out_len = (P - K) // old_sr + 1           # valid output frames
        NB = -(-out_len // SB)                    # superblocks per batch row

        # Zero-pad the tail so every superblock window is in range; the extra frames
        # it produces land past the final truncation point and are discarded.
        needed = (NB - 1) * SB * old_sr + Kwin
        if needed > P:
            xpad = jnp.pad(xpad, ((0, 0), (0, needed - P)))

        # Unfold into overlapping superblock windows (same trick as _pad_to_block);
        # overlap overhead per window is only ~K/(SB*old_sr) of the input bytes.
        idx = (np.arange(NB, dtype=np.int64)[:, None] * (SB * old_sr)
               + np.arange(Kwin, dtype=np.int64)[None, :]).astype(np.int32)
        Xmat = xpad[:, idx].reshape(B * NB, Kwin)  # [M_total, Kwin]

        M_total = B * NB
        if M_total >= 256:
            TM = 256
        elif M_total >= 128:
            TM = 128
        else:
            TM = _round_up(M_total, 8)
        M_pad = _round_up(M_total, TM)
        if M_pad > M_total:
            Xmat = jnp.pad(Xmat, ((0, M_pad - M_total), (0, 0)))

        # VMEM budget: 2x (input tile + weight + output tile) + headroom, capped below
        # v7x physical VMEM (64 MiB).
        block_bytes = 4 * (TM * Kwin + Kwin * N_mat + TM * N_mat)
        vmem_limit = int(min(60 * 1024 * 1024,
                             max(2 * block_bytes + (2 << 20), 32 * 1024 * 1024)))

        out = pl.pallas_call(
            _resample_matmul_kernel,
            out_shape=jax.ShapeDtypeStruct((M_pad, N_mat), jnp.float32),
            grid=(M_pad // TM,),
            in_specs=[
                pl.BlockSpec((TM, Kwin), lambda i: (i, 0)),
                pl.BlockSpec((Kwin, N_mat), lambda i: (0, 0)),  # constant: not re-DMA'd
            ],
            out_specs=pl.BlockSpec((TM, N_mat), lambda i: (i, 0)),
            compiler_params=pltpu.CompilerParams(
                dimension_semantics=("parallel",),
                vmem_limit_bytes=vmem_limit,
            ),
        )(Xmat, Wb)  # [M_pad, N_mat]

        # row (b, c), column g*new_sr + i  ->  output time index c*SB*new_sr + g*new_sr + i
        ys = out[:M_total].reshape(B, NB * N_mat)
        target = int(new_sr * T / old_sr)
        y = ys[:, :target]
        return jnp.reshape(y, tuple(shape[:-1]) + (target,))

    meta = dict(old_sr=old_sr, new_sr=new_sr, width=width, bank=bank64, SB=SB)
    return resample, meta


def _reference_resample(x, meta):
    """Ground-truth reference: numpy float64 direct strided FIR (same filter bank)."""
    old_sr, new_sr, width = meta["old_sr"], meta["new_sr"], meta["width"]
    W = np.asarray(meta["bank"], dtype=np.float64)  # [new_sr, K]
    K = W.shape[-1]
    x = np.asarray(x, dtype=np.float64)
    shape = x.shape
    T = shape[-1]
    xb = x.reshape(-1, T)
    xpad = np.pad(xb, ((0, 0), (width, width + old_sr)), mode="edge")
    P = xpad.shape[-1]
    out_len = (P - K) // old_sr + 1
    B = xb.shape[0]
    ys = np.zeros((B, out_len, new_sr), dtype=np.float64)
    for o in range(out_len):
        ys[:, o, :] = xpad[:, o * old_sr: o * old_sr + K] @ W.T
    ys = ys.reshape(B, out_len * new_sr)
    target = int(new_sr * T / old_sr)
    return ys[:, :target].reshape(shape[:-1] + (target,))


if __name__ == "__main__":
    # Small deterministic example: resample 4 -> 5 (like ResampleFrac(4, 5) docstring),
    # input [*, T] with * = (2, 4) and T = 64  ->  output [2, 4, 80].
    key = jax.random.PRNGKey(0)
    x = jax.random.normal(key, (2, 4, 64), dtype=jnp.float32)

    resample, meta = make_resample(4, 5)
    resample_j = jax.jit(resample)
    y = jax.block_until_ready(resample_j(x))

    expected_len = int(meta["new_sr"] * x.shape[-1] / meta["old_sr"])
    assert y.shape == (2, 4, expected_len), y.shape

    y_ref = _reference_resample(np.asarray(x), meta)
    err = float(np.max(np.abs(np.asarray(y, dtype=np.float64) - y_ref)))
    assert err < 1e-2, err

    print("KERNEL_OK")
</pallas_src>

<mosaic_0001>
module attributes {stable_mosaic.version = 11 : i64} {
  func.func @_resample_matmul_kernel(%arg0: i32, %arg1: memref<8x568xf32, #tpu.memory_space<vmem>>, %arg2: memref<568x640xf32, #tpu.memory_space<vmem>>, %arg3: memref<8x640xf32, #tpu.memory_space<vmem>>) attributes {dimension_semantics = [#tpu.dimension_semantics<parallel>], iteration_bounds = array<i64: 1>, scalar_prefetch = 0 : i64, scratch_operands = 0 : i64, tpu.core_type = #tpu.core_type<tc>, window_params = [{transform_indices = @transform_0, window_bounds = array<i64: 8, 568>}, {pipeline_mode = #tpu.pipeline_mode<synchronous>, transform_indices = @transform_1, window_bounds = array<i64: 568, 640>}, {transform_indices = @transform_2, window_bounds = array<i64: 8, 640>}]} {
    %c0 = arith.constant 0 : index
    %c0_0 = arith.constant 0 : index
    %0 = vector.load %arg1[%c0, %c0_0] : memref<8x568xf32, #tpu.memory_space<vmem>>, vector<8x568xf32>
    %c0_1 = arith.constant 0 : index
    %c0_2 = arith.constant 0 : index
    %1 = vector.load %arg2[%c0_1, %c0_2] : memref<568x640xf32, #tpu.memory_space<vmem>>, vector<568x640xf32>
    %cst = arith.constant dense<0.000000e+00> : vector<8x640xf32>
    %2 = tpu.matmul %0, %1, %cst {dimension_numbers = #tpu.dot_dimension_numbers<[1], [0], [0], [1], [0, 0, 1, 1], [], []>} : vector<8x568xf32>, vector<568x640xf32>, vector<8x640xf32> -> vector<8x640xf32>
    %c0_3 = arith.constant 0 : index
    %c0_4 = arith.constant 0 : index
    %3 = vector.load %arg3[%c0_3, %c0_4] : memref<8x640xf32, #tpu.memory_space<vmem>>, vector<8x640xf32>
    tpu.vector_store %arg3[%c0_3, %c0_4], %2 {strides = array<i32>} : memref<8x640xf32, #tpu.memory_space<vmem>>, vector<8x640xf32>,
    return
  }
  func.func @transform_0(%arg0: i32) -> (i32, i32) {
    %c0_i32 = arith.constant 0 : i32
    %c0_i32_0 = arith.constant 0 : i32
    return %arg0, %c0_i32 : i32, i32
  }
  func.func @transform_1(%arg0: i32) -> (i32, i32) {
    %c0_i32 = arith.constant 0 : i32
    %c0_i32_0 = arith.constant 0 : i32
    %c0_i32_1 = arith.constant 0 : i32
    return %c0_i32, %c0_i32_0 : i32, i32
  }
  func.func @transform_2(%arg0: i32) -> (i32, i32) {
    %c0_i32 = arith.constant 0 : i32
    %c0_i32_0 = arith.constant 0 : i32
    return %arg0, %c0_i32 : i32, i32
  }
}

</mosaic_0001>

<bundles_post_ra>
// kernel: resample.1
= control target key start
LH: loop header
LB: loop body
LE: loop exit
PB: predicated region body
PF: predicated region fallthrough
CT: control target
= control target key end

     0   :  { %7 = vsyncpa [#allocation3], 0  ;;  %s940_s12 = smov [#allocation2]   ;;  %s941_s14 = smov 640   ;;  %s1041_s0 = inlined_call_operand.vmem [shape: f32[8,568], index: 0, kind: input, shape index: {}]   ;;  %s1042_s1 = inlined_call_operand.hbm [shape: f32[568,640], index: 1, kind: input, shape index: {}]   ;;  %s1043_s2 = inlined_call_operand.vmem [shape: f32[8,640], index: 2, kind: output, shape index: {}]  }
   0x1   :  { %s14_s11 = sshll.u32 %s1042_s1, 4  ;;  %s16_s13 = sshll.u32 %s940_s12, 4  ;;  %s15_s11 = int_to_ptr.hbm [resolvable:$true] %s14_s11  ;;  %s17_s13 = int_to_ptr.vmem [resolvable:$true] %s16_s13 }
   0x2   :  { %s942_s15 = smov 40  }
   0x3   :  { %22 = dma.hbm_to_vmem [thread:$0]  %s15_s11, 45440, %s17_s13, [#allocation3], %s941_s14, %s941_s14, %s942_s15  }
   0x4   :  { %938 = dma.done.wait [#allocation3], 45440  }
   0x5   :  { %939 = vsyncadd [#allocation3], 4294921856  ;;  %v107_v0 = vld [vmem:[#allocation2 + $0x258] sm:$0xff]  ;;  %v102_v2 = vld [vmem:[#allocation2 + $0x230] sm:$0xff]  ;;  %vm387_vm0 = vcmask 457728  }
   0x6   :  { %v267_v1 = vld [vmem:[#allocation2 + $0x758] sm:$0xff]  ;;  %391 = vmatpush.msra.mxu0 %v107_v0  ;;  %v262_v3 = vld [vmem:[#allocation2 + $0x730] sm:$0xff]  ;;  %v97_v5 = vld [vmem:[#allocation2 + $0x208] sm:$0xff] }
   0x7   :  { %431 = vmatpush.msra.mxu2 %v267_v1  ;;  %v347_v4 = vld [vmem:[#allocation2 + $0x9d8] sm:$0xff]  ;;  %v257_v7 = vld [vmem:[#allocation2 + $0x708] sm:$0xff]  ;;  %v342_v8 = vld [vmem:[#allocation2 + $0x9b0] sm:$0xff] }
   0x8   :  { %451 = vmatpush.msra.mxu3 %v347_v4  ;;  %v187_v6 = vld [vmem:[#allocation2 + $0x4d8] sm:$0xff]  ;;  %392 = vmatpush.msra.mxu0 %v102_v2  ;;  %v182_v9 = vld [vmem:[#allocation2 + $0x4b0] sm:$0xff]  ;;  %v92_v10 = vld [vmem:[#allocation2 + $0x1e0] sm:$0xff] }
   0x9   :  { %432 = vmatpush.msra.mxu2 %v262_v3  ;;  %411 = vmatpush.msra.mxu1 %v187_v6  ;;  %v252_v11 = vld [vmem:[#allocation2 + $0x6e0] sm:$0xff]  ;;  %v337_v12 = vld [vmem:[#allocation2 + $0x988] sm:$0xff]  ;;  %v87_v15 = vld [vmem:[#allocation2 + $0x1b8] sm:$0xff] }
   0xa   :  { %452 = vmatpush.msra.mxu3 %v342_v8  ;;  %393 = vmatpush.msra.mxu0 %v97_v5  ;;  %v177_v13 = vld [vmem:[#allocation2 + $0x488] sm:$0xff]  ;;  %v332_v14 = vld [vmem:[#allocation2 + $0x960] sm:$0xff]  ;;  %v247_v16 = vld [vmem:[#allocation2 + $0x6b8] sm:$0xff] }
   0xb   :  { %433 = vmatpush.msra.mxu2 %v257_v7  ;;  %412 = vmatpush.msra.mxu1 %v182_v9  ;;  %v172_v17 = vld [vmem:[#allocation2 + $0x460] sm:$0xff]  ;;  %v327_v18 = vld [vmem:[#allocation2 + $0x938] sm:$0xff]  ;;  %v82_v19 = vld [vmem:[#allocation2 + $0x190] sm:$0xff] }
   0xc   :  { %453 = vmatpush.msra.mxu3 %v337_v12  ;;  %394 = vmatpush.msra.mxu0 %v92_v10  ;;  %v242_v20 = vld [vmem:[#allocation2 + $0x690] sm:$0xff]  ;;  %v167_v21 = vld [vmem:[#allocation2 + $0x438] sm:$0xff]  ;;  %v77_v23 = vld [vmem:[#allocation2 + $0x168] sm:$0xff] }
   0xd   :  { %434 = vmatpush.msra.mxu2 %v252_v11  ;;  %413 = vmatpush.msra.mxu1 %v177_v13  ;;  %v322_v22 = vld [vmem:[#allocation2 + $0x910] sm:$0xff]  ;;  %v237_v24 = vld [vmem:[#allocation2 + $0x668] sm:$0xff]  ;;  %v72_v27 = vld [vmem:[#allocation2 + $0x140] sm:$0xff] }
   0xe   :  { %454 = vmatpush.msra.mxu3 %v332_v14  ;;  %395 = vmatpush.msra.mxu0 %v87_v15  ;;  %v162_v25 = vld [vmem:[#allocation2 + $0x410] sm:$0xff]  ;;  %v317_v26 = vld [vmem:[#allocation2 + $0x8e8] sm:$0xff]  ;;  %v232_v28 = vld [vmem:[#allocation2 + $0x640] sm:$0xff] }
   0xf   :  { %435 = vmatpush.msra.mxu2 %v247_v16  ;;  %414 = vmatpush.msra.mxu1 %v172_v17  ;;  %v157_v29 = vld [vmem:[#allocation2 + $0x3e8] sm:$0xff]  ;;  %v312_v30 = vld [vmem:[#allocation2 + $0x8c0] sm:$0xff]  ;;  %v67_v31 = vld [vmem:[#allocation2 + $0x118] sm:$0xff] }
  0x10   :  { %455 = vmatpush.msra.mxu3 %v327_v18  ;;  %396 = vmatpush.msra.mxu0 %v82_v19  ;;  %v227_v32 = vld [vmem:[#allocation2 + $0x618] sm:$0xff]  ;;  %v152_v33 = vld [vmem:[#allocation2 + $0x3c0] sm:$0xff]  ;;  %v62_v35 = vld [vmem:[#allocation2 + $0xf0] sm:$0xff] }
  0x11   :  { %436 = vmatpush.msra.mxu2 %v242_v20  ;;  %415 = vmatpush.msra.mxu1 %v167_v21  ;;  %v307_v34 = vld [vmem:[#allocation2 + $0x898] sm:$0xff]  ;;  %v222_v36 = vld [vmem:[#allocation2 + $0x5f0] sm:$0xff]  ;;  %v57_v39 = vld [vmem:[#allocation2 + $0xc8] sm:$0xff] }
  0x12   :  { %456 = vmatpush.msra.mxu3 %v322_v22  ;;  %397 = vmatpush.msra.mxu0 %v77_v23  ;;  %v147_v37 = vld [vmem:[#allocation2 + $0x398] sm:$0xff]  ;;  %v302_v38 = vld [vmem:[#allocation2 + $0x870] sm:$0xff]  ;;  %v217_v40 = vld [vmem:[#allocation2 + $0x5c8] sm:$0xff] }
  0x13   :  { %437 = vmatpush.msra.mxu2 %v237_v24  ;;  %416 = vmatpush.msra.mxu1 %v162_v25  ;;  %v142_v41 = vld [vmem:[#allocation2 + $0x370] sm:$0xff]  ;;  %v297_v42 = vld [vmem:[#allocation2 + $0x848] sm:$0xff]  ;;  %v52_v43 = vld [vmem:[#allocation2 + $0xa0] sm:$0xff] }
  0x14   :  { %457 = vmatpush.msra.mxu3 %v317_v26  ;;  %398 = vmatpush.msra.mxu0 %v72_v27  ;;  %v212_v44 = vld [vmem:[#allocation2 + $0x5a0] sm:$0xff]  ;;  %v137_v45 = vld [vmem:[#allocation2 + $0x348] sm:$0xff]  ;;  %v47_v47 = vld [vmem:[#allocation2 + $0x78] sm:$0xff] }
  0x15   :  { %438 = vmatpush.msra.mxu2 %v232_v28  ;;  %417 = vmatpush.msra.mxu1 %v157_v29  ;;  %v292_v46 = vld [vmem:[#allocation2 + $0x820] sm:$0xff]  ;;  %v207_v48 = vld [vmem:[#allocation2 + $0x578] sm:$0xff]  ;;  %v42_v51 = vld [vmem:[#allocation2 + $0x50] sm:$0xff] }
  0x16   :  { %458 = vmatpush.msra.mxu3 %v312_v30  ;;  %399 = vmatpush.msra.mxu0 %v67_v31  ;;  %v132_v49 = vld [vmem:[#allocation2 + $0x320] sm:$0xff]  ;;  %v287_v50 = vld [vmem:[#allocation2 + $0x7f8] sm:$0xff]  ;;  %v202_v52 = vld [vmem:[#allocation2 + $0x550] sm:$0xff] }
  0x17   :  { %439 = vmatpush.msra.mxu2 %v227_v32  ;;  %418 = vmatpush.msra.mxu1 %v152_v33  ;;  %v127_v53 = vld [vmem:[#allocation2 + $0x2f8] sm:$0xff]  ;;  %v282_v54 = vld [vmem:[#allocation2 + $0x7d0] sm:$0xff]  ;;  %v37_v55 = vld [vmem:[#allocation2 + $0x28] sm:$0xff] }
  0x18   :  { %459 = vmatpush.msra.mxu3 %v307_v34  ;;  %400 = vmatpush.msra.mxu0 %v62_v35  ;;  %v197_v56 = vld [vmem:[#allocation2 + $0x528] sm:$0xff]  ;;  %v122_v57 = vld [vmem:[#allocation2 + $0x2d0] sm:$0xff]  ;;  %v32_v59 = vld [vmem:[#allocation2] sm:$0xff] }
  0x19   :  { %440 = vmatpush.msra.mxu2 %v222_v36  ;;  %419 = vmatpush.msra.mxu1 %v147_v37  ;;  %v277_v58 = vld [vmem:[#allocation2 + $0x7a8] sm:$0xff]  ;;  %v192_v60 = vld [vmem:[#allocation2 + $0x500] sm:$0xff]  ;;  %v382_v61 = vld [vmem:[#allocation2 + $0xaf0] sm:$0xff] }
  0x1a   :  { %460 = vmatpush.msra.mxu3 %v302_v38  ;;  %401 = vmatpush.msra.mxu0 %v57_v39  ;;  %v188_v62 = vld [vmem:[#allocation2 + $0x4e0] sm:$0xff]  ;;  %v117_v63 = vld [vmem:[#allocation2 + $0x2a8] sm:$0xff]  ;;  %v183_v2 = vld [vmem:[#allocation2 + $0x4b8] sm:$0xff] }
  0x1b   :  { %441 = vmatpush.msra.mxu2 %v217_v40  ;;  %420 = vmatpush.msra.mxu1 %v142_v41  ;;  %v272_v0 = vld [vmem:[#allocation2 + $0x780] sm:$0xff]  ;;  %v377_v1 = vld [vmem:[#allocation2 + $0xac8] sm:$0xff]  ;;  %v178_v7 = vld [vmem:[#allocation2 + $0x490] sm:$0xff] }
  0x1c   :  { %461 = vmatpush.msra.mxu3 %v297_v42  ;;  %402 = vmatpush.msra.mxu0 %v52_v43  ;;  %v268_v3 = vld [vmem:[#allocation2 + $0x760] sm:$0xff]  ;;  %v263_v8 = vld [vmem:[#allocation2 + $0x738] sm:$0xff]  ;;  %v173_v11 = vld [vmem:[#allocation2 + $0x468] sm:$0xff] }
  0x1d   :  { %442 = vmatpush.msra.mxu2 %v212_v44  ;;  %421 = vmatpush.msra.mxu1 %v137_v45  ;;  %v112_v4 = vld [vmem:[#allocation2 + $0x280] sm:$0xff]  ;;  %v367_v9 = vld [vmem:[#allocation2 + $0xa78] sm:$0xff]  ;;  %v258_v12 = vld [vmem:[#allocation2 + $0x710] sm:$0xff] }
  0x1e   :  { %462 = vmatpush.msra.mxu3 %v292_v46  ;;  %403 = vmatpush.msra.mxu0 %v47_v47  ;;  %v372_v5 = vld [vmem:[#allocation2 + $0xaa0] sm:$0xff]  ;;  %v103_v10 = vld [vmem:[#allocation2 + $0x238] sm:$0xff]  ;;  %v362_v13 = vld [vmem:[#allocation2 + $0xa50] sm:$0xff] }
  0x1f   :  { %443 = vmatpush.msra.mxu2 %v207_v48  ;;  %422 = vmatpush.msra.mxu1 %v132_v49  ;;  %v108_v6 = vld [vmem:[#allocation2 + $0x260] sm:$0xff]  ;;  %v964_v14 = vld [vmem:[%s1041_s0 + $0x10] sm:$0xff]  ;;  %v253_v17 = vld [vmem:[#allocation2 + $0x6e8] sm:$0xff] }
  0x20   :  { %463 = vmatpush.msra.mxu3 %v287_v50  ;;  %404 = vmatpush.msra.mxu0 %v42_v51  ;;  %v98_v15 = vld [vmem:[#allocation2 + $0x210] sm:$0xff]  ;;  %v168_v16 = vld [vmem:[#allocation2 + $0x440] sm:$0xff]  ;;  %v357_v18 = vld [vmem:[#allocation2 + $0xa28] sm:$0xff] }
  0x21   :  { %444 = vmatpush.msra.mxu2 %v202_v52  ;;  %423 = vmatpush.msra.mxu1 %v127_v53  ;;  %v970_v19 = vld [vmem:[%s1041_s0] sm:$0xff]  ;;  %v975_v20 = vld [vmem:[%s1041_s0 + $0x18] sm:$0xff]  ;;  %v93_v21 = vld [vmem:[#allocation2 + $0x1e8] sm:$0xff] }
  0x22   :  { %464 = vmatpush.msra.mxu3 %v282_v54  ;;  %405 = vmatpush.msra.mxu0 %v37_v55  ;;  %v163_v22 = vld [vmem:[#allocation2 + $0x418] sm:$0xff]  ;;  %v248_v23 = vld [vmem:[#allocation2 + $0x6c0] sm:$0xff]  ;;  %v982_v25 = vld [vmem:[%s1041_s0 + $0x8] sm:$0xff] }
  0x23   :  { %445 = vmatpush.msra.mxu2 %v197_v56  ;;  %424 = vmatpush.msra.mxu1 %v122_v57  ;;  %v352_v24 = vld [vmem:[#allocation2 + $0xa00] sm:$0xff]  ;;  %v158_v26 = vld [vmem:[#allocation2 + $0x3f0] sm:$0xff]  ;;  %v243_v28 = vld [vmem:[#allocation2 + $0x698] sm:$0xff] }
  0x24   :  { %465 = vmatpush.msra.mxu3 %v277_v58  ;;  %406 = vmatpush.msra.mxu0 %v32_v59  ;;  %v88_v27 = vld [vmem:[#allocation2 + $0x1c0] sm:$0xff]  ;;  %v153_v30 = vld [vmem:[#allocation2 + $0x3c8] sm:$0xff]  ;;  %v83_v31 = vld [vmem:[#allocation2 + $0x198] sm:$0xff] }
  0x25   :  { %446 = vmatpush.msra.mxu2 %v192_v60  ;;  %425 = vmatpush.msra.mxu1 %v117_v63  ;;  %v348_v29 = vld [vmem:[#allocation2 + $0x9e0] sm:$0xff]  ;;  %v238_v32 = vld [vmem:[#allocation2 + $0x670] sm:$0xff]  ;;  %v343_v33 = vld [vmem:[#allocation2 + $0x9b8] sm:$0xff] }
  0x26   :  { %480 = vmatpush.msrb.mxu0 %v382_v61  ;;  %466 = vmatpush.msra.mxu3 %v272_v0  ;;  %v148_v34 = vld [vmem:[#allocation2 + $0x3a0] sm:$0xff]  ;;  %v78_v35 = vld [vmem:[#allocation2 + $0x170] sm:$0xff]  ;;  %v233_v36 = vld [vmem:[#allocation2 + $0x648] sm:$0xff] }
  0x27   :  { %511 = vmatpush.msrb.mxu2 %v188_v62  ;;  %426 = vmatpush.msra.mxu1 %v112_v4  ;;  %v338_v37 = vld [vmem:[#allocation2 + $0x990] sm:$0xff]  ;;  %v143_v38 = vld [vmem:[#allocation2 + $0x378] sm:$0xff]  ;;  %v988_v39 = vld [vmem:[%s1041_s0 + $0x20] sm:$0xff] }
  0x28   :  { %481 = vmatpush.msrb.mxu0 %v377_v1  ;;  %531 = vmatpush.msrb.mxu3 %v268_v3  ;;  %v73_v40 = vld [vmem:[#allocation2 + $0x148] sm:$0xff]  ;;  %v228_v41 = vld [vmem:[#allocation2 + $0x620] sm:$0xff]  ;;  %v138_v44 = vld [vmem:[#allocation2 + $0x350] sm:$0xff] }
  0x29   :  { %512 = vmatpush.msrb.mxu2 %v183_v2  ;;  %491 = vmatpush.msrb.mxu1 %v108_v6  ;;  %v333_v42 = vld [vmem:[#allocation2 + $0x968] sm:$0xff]  ;;  %v68_v43 = vld [vmem:[#allocation2 + $0x120] sm:$0xff]  ;;  %v223_v45 = vld [vmem:[#allocation2 + $0x5f8] sm:$0xff] }
  0x2a   :  { %482 = vmatpush.msrb.mxu0 %v372_v5  ;;  %532 = vmatpush.msrb.mxu3 %v263_v8  ;;  %v328_v46 = vld [vmem:[#allocation2 + $0x940] sm:$0xff]  ;;  %v63_v47 = vld [vmem:[#allocation2 + $0xf8] sm:$0xff]  ;;  %v133_v48 = vld [vmem:[#allocation2 + $0x328] sm:$0xff] }
  0x2b   :  { %513 = vmatpush.msrb.mxu2 %v178_v7  ;;  %492 = vmatpush.msrb.mxu1 %v103_v10  ;;  %v218_v49 = vld [vmem:[#allocation2 + $0x5d0] sm:$0xff]  ;;  %v323_v50 = vld [vmem:[#allocation2 + $0x918] sm:$0xff]  ;;  %v128_v52 = vld [vmem:[#allocation2 + $0x300] sm:$0xff] }
  0x2c   :  { %483 = vmatpush.msrb.mxu0 %v367_v9  ;;  %533 = vmatpush.msrb.mxu3 %v258_v12  ;;  %v58_v51 = vld [vmem:[#allocation2 + $0xd0] sm:$0xff]  ;;  %v213_v53 = vld [vmem:[#allocation2 + $0x5a8] sm:$0xff]  ;;  %v123_v56 = vld [vmem:[#allocation2 + $0x2d8] sm:$0xff] }
  0x2d   :  { %514 = vmatpush.msrb.mxu2 %v173_v11  ;;  %493 = vmatpush.msrb.mxu1 %v98_v15  ;;  %v318_v54 = vld [vmem:[#allocation2 + $0x8f0] sm:$0xff]  ;;  %v53_v55 = vld [vmem:[#allocation2 + $0xa8] sm:$0xff]  ;;  %v208_v57 = vld [vmem:[#allocation2 + $0x580] sm:$0xff] }
  0x2e   :  { %484 = vmatpush.msrb.mxu0 %v362_v13  ;;  %447 = vmatmul.f32.vlgmr.msra.gmra.mxu2 %v964_v14  ;;  %v313_v58 = vld [vmem:[#allocation2 + $0x8c8] sm:$0xff]  ;;  %v48_v59 = vld [vmem:[#allocation2 + $0x80] sm:$0xff]  ;;  %v118_v60 = vld [vmem:[#allocation2 + $0x2b0] sm:$0xff] }
  0x2f   :  { %515 = vmatpush.msrb.mxu2 %v168_v16  ;;  %534 = vmatpush.msrb.mxu3 %v253_v17  ;;  %v203_v61 = vld [vmem:[#allocation2 + $0x558] sm:$0xff]  ;;  %v308_v62 = vld [vmem:[#allocation2 + $0x8a0] sm:$0xff]  ;;  %v113_v0 = vld [vmem:[#allocation2 + $0x288] sm:$0xff] }
  0x30   :  { %485 = vmatpush.msrb.mxu0 %v357_v18  ;;  %467 = vmatmul.f32.vlgmr.msra.gmra.mxu3 %v975_v20  ;;  %v43_v63 = vld [vmem:[#allocation2 + $0x58] sm:$0xff]  ;;  %v198_v1 = vld [vmem:[#allocation2 + $0x530] sm:$0xff]  ;;  %v109_v3 = vld [vmem:[#allocation2 + $0x268] sm:$0xff] }
  0x31   :  { %407 = vmatmul.f32.vlgmr.msra.gmra.mxu0 %v970_v19  ;;  %494 = vmatpush.msrb.mxu1 %v93_v21  ;;  %v303_v2 = vld [vmem:[#allocation2 + $0x878] sm:$0xff]  ;;  %v38_v4 = vld [vmem:[#allocation2 + $0x30] sm:$0xff]  ;;  %v193_v5 = vld [vmem:[#allocation2 + $0x508] sm:$0xff] }
  0x32   :  { %516 = vmatpush.msrb.mxu2 %v163_v22  ;;  %535 = vmatpush.msrb.mxu3 %v248_v23  ;;  %v298_v6 = vld [vmem:[#allocation2 + $0x850] sm:$0xff]  ;;  %v104_v7 = vld [vmem:[#allocation2 + $0x240] sm:$0xff]  ;;  %v189_v8 = vld [vmem:[#allocation2 + $0x4e8] sm:$0xff] }
  0x33   :  { %486 = vmatpush.msrb.mxu0 %v352_v24  ;;  %427 = vmatmul.f32.vlgmr.msra.gmra.mxu1 %v982_v25  ;;  %v33_v9 = vld [vmem:[#allocation2 + $0x8] sm:$0xff]  ;;  %v383_v11 = vld [vmem:[#allocation2 + $0xaf8] sm:$0xff]  ;;  %v184_v13 = vld [vmem:[#allocation2 + $0x4c0] sm:$0xff] }
  0x34   :  { %517 = vmatpush.msrb.mxu2 %v158_v26  ;;  %495 = vmatpush.msrb.mxu1 %v88_v27  ;;  %v293_v10 = vld [vmem:[#allocation2 + $0x828] sm:$0xff]  ;;  %v99_v12 = vld [vmem:[#allocation2 + $0x218] sm:$0xff]  ;;  %v288_v15 = vld [vmem:[#allocation2 + $0x800] sm:$0xff] }
  0x35   :  { %536 = vmatpush.msrb.mxu3 %v243_v28  ;;  %551 = vmatpush.msra.mxu0 %v348_v29  ;;  %v378_v16 = vld [vmem:[#allocation2 + $0xad0] sm:$0xff]  ;;  %v179_v18 = vld [vmem:[#allocation2 + $0x498] sm:$0xff]  ;;  %v373_v22 = vld [vmem:[#allocation2 + $0xaa8] sm:$0xff] }
  0x36   :  { %518 = vmatpush.msrb.mxu2 %v153_v30  ;;  %496 = vmatpush.msrb.mxu1 %v83_v31  ;;  %v94_v17 = vld [vmem:[#allocation2 + $0x1f0] sm:$0xff]  ;;  %v283_v21 = vld [vmem:[#allocation2 + $0x7d8] sm:$0xff]  ;;  %v89_v23 = vld [vmem:[#allocation2 + $0x1c8] sm:$0xff] }
  0x37   :  { %537 = vmatpush.msrb.mxu3 %v238_v32  ;;  %552 = vmatpush.msra.mxu0 %v343_v33  ;;  %v174_v24 = vld [vmem:[#allocation2 + $0x470] sm:$0xff]  ;;  %v368_v27 = vld [vmem:[#allocation2 + $0xa80] sm:$0xff]  ;;  %v169_v29 = vld [vmem:[#allocation2 + $0x448] sm:$0xff] }
  0x38   :  { %519 = vmatpush.msrb.mxu2 %v148_v34  ;;  %497 = vmatpush.msrb.mxu1 %v78_v35  ;;  %v278_v26 = vld [vmem:[#allocation2 + $0x7b0] sm:$0xff]  ;;  %v84_v28 = vld [vmem:[#allocation2 + $0x1a0] sm:$0xff]  ;;  %v273_v30 = vld [vmem:[#allocation2 + $0x788] sm:$0xff] }
  0x39   :  { %538 = vmatpush.msrb.mxu3 %v233_v36  ;;  %553 = vmatpush.msra.mxu0 %v338_v37  ;;  %v363_v31 = vld [vmem:[#allocation2 + $0xa58] sm:$0xff]  ;;  %v164_v33 = vld [vmem:[#allocation2 + $0x420] sm:$0xff]  ;;  %v269_v34 = vld [vmem:[#allocation2 + $0x768] sm:$0xff] }
  0x3a   :  { %520 = vmatpush.msrb.mxu2 %v143_v38  ;;  %901 = vmatmul.msk.f32.vlgmr.msrb.gmra.mxu0 %vm387_vm0, %v988_v39  ;;  %v79_v32 = vld [vmem:[#allocation2 + $0x178] sm:$0xff]  ;;  %v358_v35 = vld [vmem:[#allocation2 + $0xa30] sm:$0xff]  ;;  %v264_v38 = vld [vmem:[#allocation2 + $0x740] sm:$0xff] }
  0x3b   :  { %498 = vmatpush.msrb.mxu1 %v73_v40  ;;  %539 = vmatpush.msrb.mxu3 %v228_v41  ;;  %v74_v36 = vld [vmem:[#allocation2 + $0x150] sm:$0xff]  ;;  %v159_v37 = vld [vmem:[#allocation2 + $0x3f8] sm:$0xff]  ;;  %v353_v40 = vld [vmem:[#allocation2 + $0xa08] sm:$0xff] }
  0x3c   :  { %554 = vmatpush.msra.mxu0 %v333_v42  ;;  %521 = vmatpush.msrb.mxu2 %v138_v44  ;;  %v69_v41 = vld [vmem:[#allocation2 + $0x128] sm:$0xff]  ;;  %v154_v42 = vld [vmem:[#allocation2 + $0x3d0] sm:$0xff]  ;;  %v64_v44 = vld [vmem:[#allocation2 + $0x100] sm:$0xff] }
  0x3d   :  { %499 = vmatpush.msrb.mxu1 %v68_v43  ;;  %540 = vmatpush.msrb.mxu3 %v223_v45  ;;  %v259_v43 = vld [vmem:[#allocation2 + $0x718] sm:$0xff]  ;;  %v349_v45 = vld [vmem:[#allocation2 + $0x9e8] sm:$0xff] }
  0x3e   :  { %555 = vmatpush.msra.mxu0 %v328_v46  ;;  %522 = vmatpush.msrb.mxu2 %v133_v48  ;;  %v149_v46 = vld [vmem:[#allocation2 + $0x3a8] sm:$0xff]  ;;  %v59_v48 = vld [vmem:[#allocation2 + $0xd8] sm:$0xff] }
  0x3f   :  { %500 = vmatpush.msrb.mxu1 %v63_v47  ;;  %541 = vmatpush.msrb.mxu3 %v218_v49  ;;  %v254_v47 = vld [vmem:[#allocation2 + $0x6f0] sm:$0xff]  ;;  %v344_v49 = vld [vmem:[#allocation2 + $0x9c0] sm:$0xff] }
  0x40   :  { %556 = vmatpush.msra.mxu0 %v323_v50  ;;  %523 = vmatpush.msrb.mxu2 %v128_v52  ;;  %v144_v50 = vld [vmem:[#allocation2 + $0x380] sm:$0xff]  ;;  %v54_v52 = vld [vmem:[#allocation2 + $0xb0] sm:$0xff] }
  0x41   :  { %501 = vmatpush.msrb.mxu1 %v58_v51  ;;  %542 = vmatpush.msrb.mxu3 %v213_v53  ;;  %v249_v51 = vld [vmem:[#allocation2 + $0x6c8] sm:$0xff]  ;;  %v339_v53 = vld [vmem:[#allocation2 + $0x998] sm:$0xff] }
  0x42   :  { %557 = vmatpush.msra.mxu0 %v318_v54  ;;  %524 = vmatpush.msrb.mxu2 %v123_v56  ;;  %v139_v54 = vld [vmem:[#allocation2 + $0x358] sm:$0xff]  ;;  %v49_v56 = vld [vmem:[#allocation2 + $0x88] sm:$0xff] }
  0x43   :  { %502 = vmatpush.msrb.mxu1 %v53_v55  ;;  %543 = vmatpush.msrb.mxu3 %v208_v57  ;;  %v244_v55 = vld [vmem:[#allocation2 + $0x6a0] sm:$0xff]  ;;  %v334_v57 = vld [vmem:[#allocation2 + $0x970] sm:$0xff] }
  0x44   :  { %558 = vmatpush.msra.mxu0 %v313_v58  ;;  %525 = vmatpush.msrb.mxu2 %v118_v60  ;;  %v134_v58 = vld [vmem:[#allocation2 + $0x330] sm:$0xff]  ;;  %v44_v60 = vld [vmem:[#allocation2 + $0x60] sm:$0xff] }
  0x45   :  { %503 = vmatpush.msrb.mxu1 %v48_v59  ;;  %544 = vmatpush.msrb.mxu3 %v203_v61  ;;  %v239_v59 = vld [vmem:[#allocation2 + $0x678] sm:$0xff]  ;;  %v329_v61 = vld [vmem:[#allocation2 + $0x948] sm:$0xff] }
  0x46   :  { %559 = vmatpush.msra.mxu0 %v308_v62  ;;  %526 = vmatpush.msrb.mxu2 %v113_v0  ;;  %v129_v62 = vld [vmem:[#allocation2 + $0x308] sm:$0xff]  ;;  %v39_v0 = vld [vmem:[#allocation2 + $0x38] sm:$0xff] }
  0x47   :  { %504 = vmatpush.msrb.mxu1 %v43_v63  ;;  %545 = vmatpush.msrb.mxu3 %v198_v1  ;;  %v234_v63 = vld [vmem:[#allocation2 + $0x650] sm:$0xff]  ;;  %v324_v1 = vld [vmem:[#allocation2 + $0x920] sm:$0xff] }
  0x48   :  { %560 = vmatpush.msra.mxu0 %v303_v2  ;;  %591 = vmatpush.msra.mxu2 %v109_v3  ;;  %v124_v2 = vld [vmem:[#allocation2 + $0x2e0] sm:$0xff]  ;;  %v229_v3 = vld [vmem:[#allocation2 + $0x628] sm:$0xff] }
  0x49   :  { %505 = vmatpush.msrb.mxu1 %v38_v4  ;;  %546 = vmatpush.msrb.mxu3 %v193_v5  ;;  %v34_v4 = vld [vmem:[#allocation2 + $0x10] sm:$0xff]  ;;  %v319_v5 = vld [vmem:[#allocation2 + $0x8f8] sm:$0xff] }
  0x4a   :  { %561 = vmatpush.msra.mxu0 %v298_v6  ;;  %592 = vmatpush.msra.mxu2 %v104_v7  ;;  %v119_v6 = vld [vmem:[#allocation2 + $0x2b8] sm:$0xff]  ;;  %v224_v7 = vld [vmem:[#allocation2 + $0x600] sm:$0xff] }
  0x4b   :  { %611 = vmatpush.msra.mxu3 %v189_v8  ;;  %506 = vmatpush.msrb.mxu1 %v33_v9  ;;  %v384_v8 = vld [vmem:[#allocation2 + $0xb00] sm:$0xff]  ;;  %v314_v9 = vld [vmem:[#allocation2 + $0x8d0] sm:$0xff] }
  0x4c   :  { %562 = vmatpush.msra.mxu0 %v293_v10  ;;  %593 = vmatpush.msra.mxu2 %v99_v12  ;;  %v114_v10 = vld [vmem:[#allocation2 + $0x290] sm:$0xff]  ;;  %v379_v12 = vld [vmem:[#allocation2 + $0xad8] sm:$0xff] }
  0x4d   :  { %580 = vmatpush.msra.mxu1 %v383_v11  ;;  %612 = vmatpush.msra.mxu3 %v184_v13  ;;  %v219_v11 = vld [vmem:[#allocation2 + $0x5d8] sm:$0xff]  ;;  %v309_v13 = vld [vmem:[#allocation2 + $0x8a8] sm:$0xff] }
  0x4e   :  { %563 = vmatpush.msra.mxu0 %v288_v15  ;;  %594 = vmatpush.msra.mxu2 %v94_v17  ;;  %v110_v15 = vld [vmem:[#allocation2 + $0x270] sm:$0xff] }
  0x4f   :  { %581 = vmatpush.msra.mxu1 %v378_v16  ;;  %613 = vmatpush.msra.mxu3 %v179_v18  ;;  %v214_v16 = vld [vmem:[#allocation2 + $0x5b0] sm:$0xff]  ;;  %v304_v18 = vld [vmem:[#allocation2 + $0x880] sm:$0xff] }
  0x50   :  { %564 = vmatpush.msra.mxu0 %v283_v21  ;;  %595 = vmatpush.msra.mxu2 %v89_v23  ;;  %v374_v17 = vld [vmem:[#allocation2 + $0xab0] sm:$0xff]  ;;  %v105_v21 = vld [vmem:[#allocation2 + $0x248] sm:$0xff] }
  0x51   :  { %582 = vmatpush.msra.mxu1 %v373_v22  ;;  %614 = vmatpush.msra.mxu3 %v174_v24  ;;  %v209_v22 = vld [vmem:[#allocation2 + $0x588] sm:$0xff]  ;;  %v299_v24 = vld [vmem:[#allocation2 + $0x858] sm:$0xff] }
  0x52   :  { %565 = vmatpush.msra.mxu0 %v278_v26  ;;  %596 = vmatpush.msra.mxu2 %v84_v28  ;;  %v369_v23 = vld [vmem:[#allocation2 + $0xa88] sm:$0xff]  ;;  %v100_v26 = vld [vmem:[#allocation2 + $0x220] sm:$0xff] }
  0x53   :  { %583 = vmatpush.msra.mxu1 %v368_v27  ;;  %615 = vmatpush.msra.mxu3 %v169_v29  ;;  %v204_v27 = vld [vmem:[#allocation2 + $0x560] sm:$0xff]  ;;  %v294_v29 = vld [vmem:[#allocation2 + $0x830] sm:$0xff] }
  0x54   :  { %566 = vmatpush.msra.mxu0 %v273_v30  ;;  %597 = vmatpush.msra.mxu2 %v79_v32  ;;  %v364_v28 = vld [vmem:[#allocation2 + $0xa60] sm:$0xff]  ;;  %v95_v30 = vld [vmem:[#allocation2 + $0x1f8] sm:$0xff] }
  0x55   :  { %584 = vmatpush.msra.mxu1 %v363_v31  ;;  %616 = vmatpush.msra.mxu3 %v164_v33  ;;  %v199_v31 = vld [vmem:[#allocation2 + $0x538] sm:$0xff]  ;;  %v289_v33 = vld [vmem:[#allocation2 + $0x808] sm:$0xff] }
  0x56   :  { %631 = vmatpush.msrb.mxu0 %v269_v34  ;;  %527 = vmatmul.f32.vlgmr.msrb.gmra.mxu2 %v982_v25  ;;  %v359_v32 = vld [vmem:[#allocation2 + $0xa38] sm:$0xff]  ;;  %v90_v34 = vld [vmem:[#allocation2 + $0x1d0] sm:$0xff] }
  0x57   :  { %585 = vmatpush.msra.mxu1 %v358_v35  ;;  %598 = vmatpush.msra.mxu2 %v74_v36  ;;  %v194_v35 = vld [vmem:[#allocation2 + $0x510] sm:$0xff] }
  0x58   :  { %617 = vmatpush.msra.mxu3 %v159_v37  ;;  %632 = vmatpush.msrb.mxu0 %v264_v38  ;;  %v354_v36 = vld [vmem:[#allocation2 + $0xa10] sm:$0xff]  ;;  %v284_v37 = vld [vmem:[#allocation2 + $0x7e0] sm:$0xff]  ;;  %v85_v38 = vld [vmem:[#allocation2 + $0x1a8] sm:$0xff] }
  0x59   :  { %547 = vmatmul.f32.vlgmr.msrb.gmra.mxu3 %v964_v14  ;;  %586 = vmatpush.msra.mxu1 %v353_v40  ;;  %v190_v40 = vld [vmem:[#allocation2 + $0x4f0] sm:$0xff] }
  0x5a   :  { %599 = vmatpush.msra.mxu2 %v69_v41  ;;  %618 = vmatpush.msra.mxu3 %v154_v42  ;;  %v350_v41 = vld [vmem:[#allocation2 + $0x9f0] sm:$0xff]  ;;  %v279_v42 = vld [vmem:[#allocation2 + $0x7b8] sm:$0xff] }
  0x5b   :  { %633 = vmatpush.msrb.mxu0 %v259_v43  ;;  %507 = vmatmul.f32.vlgmr.msrb.gmra.mxu1 %v970_v19  ;;  %v80_v43 = vld [vmem:[#allocation2 + $0x180] sm:$0xff] }
  0x5c   :  { %600 = vmatpush.msra.mxu2 %v64_v44  ;;  %651 = vmatpush.msrb.mxu1 %v349_v45  ;;  %v185_v44 = vld [vmem:[#allocation2 + $0x4c8] sm:$0xff] }
  0x5d   :  { %619 = vmatpush.msra.mxu3 %v149_v46  ;;  %634 = vmatpush.msrb.mxu0 %v254_v47  ;;  %v345_v45 = vld [vmem:[#allocation2 + $0x9c8] sm:$0xff]  ;;  %v274_v46 = vld [vmem:[#allocation2 + $0x790] sm:$0xff]  ;;  %v75_v47 = vld [vmem:[#allocation2 + $0x158] sm:$0xff] }
  0x5e   :  { %601 = vmatpush.msra.mxu2 %v59_v48  ;;  %652 = vmatpush.msrb.mxu1 %v344_v49  ;;  %v180_v48 = vld [vmem:[#allocation2 + $0x4a0] sm:$0xff]  ;;  %v270_v49 = vld [vmem:[#allocation2 + $0x770] sm:$0xff] }
  0x5f   :  { %620 = vmatpush.msra.mxu3 %v144_v50  ;;  %635 = vmatpush.msrb.mxu0 %v249_v51  ;;  %v340_v50 = vld [vmem:[#allocation2 + $0x9a0] sm:$0xff]  ;;  %v70_v51 = vld [vmem:[#allocation2 + $0x130] sm:$0xff] }
  0x60   :  { %602 = vmatpush.msra.mxu2 %v54_v52  ;;  %653 = vmatpush.msrb.mxu1 %v339_v53  ;;  %v175_v52 = vld [vmem:[#allocation2 + $0x478] sm:$0xff]  ;;  %v265_v53 = vld [vmem:[#allocation2 + $0x748] sm:$0xff] }
  0x61   :  { %621 = vmatpush.msra.mxu3 %v139_v54  ;;  %636 = vmatpush.msrb.mxu0 %v244_v55  ;;  %v335_v54 = vld [vmem:[#allocation2 + $0x978] sm:$0xff]  ;;  %v65_v55 = vld [vmem:[#allocation2 + $0x108] sm:$0xff] }
  0x62   :  { %603 = vmatpush.msra.mxu2 %v49_v56  ;;  %567 = vmatmul.f32.vlgmr.msra.gmra.mxu0 %v975_v20  ;;  %v170_v56 = vld [vmem:[#allocation2 + $0x450] sm:$0xff] }
  0x63   :  { %654 = vmatpush.msrb.mxu1 %v334_v57  ;;  %622 = vmatpush.msra.mxu3 %v134_v58  ;;  %v260_v57 = vld [vmem:[#allocation2 + $0x720] sm:$0xff]  ;;  %v330_v58 = vld [vmem:[#allocation2 + $0x950] sm:$0xff] }
  0x64   :  { %637 = vmatpush.msrb.mxu0 %v239_v59  ;;  %902 = vmatmul.msk.f32.vlgmr.msra.gmra.mxu1 %vm387_vm0, %v988_v39  ;;  %v60_v59 = vld [vmem:[#allocation2 + $0xe0] sm:$0xff] }
  0x65   :  { %604 = vmatpush.msra.mxu2 %v44_v60  ;;  %655 = vmatpush.msrb.mxu1 %v329_v61  ;;  %v165_v60 = vld [vmem:[#allocation2 + $0x428] sm:$0xff]  ;;  %v255_v61 = vld [vmem:[#allocation2 + $0x6f8] sm:$0xff] }
  0x66   :  { %623 = vmatpush.msra.mxu3 %v129_v62  ;;  %638 = vmatpush.msrb.mxu0 %v234_v63  ;;  %v325_v62 = vld [vmem:[#allocation2 + $0x928] sm:$0xff]  ;;  %v55_v63 = vld [vmem:[#allocation2 + $0xb8] sm:$0xff] }
  0x67   :  { %605 = vmatpush.msra.mxu2 %v39_v0  ;;  %656 = vmatpush.msrb.mxu1 %v324_v1  ;;  %v160_v0 = vld [vmem:[#allocation2 + $0x400] sm:$0xff]  ;;  %v250_v1 = vld [vmem:[#allocation2 + $0x6d0] sm:$0xff] }
  0x68   :  { %624 = vmatpush.msra.mxu3 %v124_v2  ;;  %639 = vmatpush.msrb.mxu0 %v229_v3  ;;  %v320_v2 = vld [vmem:[#allocation2 + $0x900] sm:$0xff]  ;;  %v50_v3 = vld [vmem:[#allocation2 + $0x90] sm:$0xff] }
  0x69   :  { %606 = vmatpush.msra.mxu2 %v34_v4  ;;  %657 = vmatpush.msrb.mxu1 %v319_v5  ;;  %v155_v4 = vld [vmem:[#allocation2 + $0x3d8] sm:$0xff]  ;;  %v245_v5 = vld [vmem:[#allocation2 + $0x6a8] sm:$0xff] }
  0x6a   :  { %625 = vmatpush.msra.mxu3 %v119_v6  ;;  %640 = vmatpush.msrb.mxu0 %v224_v7  ;;  %v315_v6 = vld [vmem:[#allocation2 + $0x8d8] sm:$0xff]  ;;  %v45_v7 = vld [vmem:[#allocation2 + $0x68] sm:$0xff] }
  0x6b   :  { %680 = vmatpush.msrb.mxu2 %v384_v8  ;;  %658 = vmatpush.msrb.mxu1 %v314_v9  ;;  %v150_v8 = vld [vmem:[#allocation2 + $0x3b0] sm:$0xff]  ;;  %v240_v9 = vld [vmem:[#allocation2 + $0x680] sm:$0xff] }
  0x6c   :  { %626 = vmatpush.msra.mxu3 %v114_v10  ;;  %641 = vmatpush.msrb.mxu0 %v219_v11  ;;  %v310_v10 = vld [vmem:[#allocation2 + $0x8b0] sm:$0xff]  ;;  %v40_v11 = vld [vmem:[#allocation2 + $0x40] sm:$0xff] }
  0x6d   :  { %681 = vmatpush.msrb.mxu2 %v379_v12  ;;  %659 = vmatpush.msrb.mxu1 %v309_v13  ;;  %v145_v12 = vld [vmem:[#allocation2 + $0x388] sm:$0xff]  ;;  %v235_v13 = vld [vmem:[#allocation2 + $0x658] sm:$0xff] }
  0x6e   :  { %691 = vmatpush.msrb.mxu3 %v110_v15  ;;  %642 = vmatpush.msrb.mxu0 %v214_v16  ;;  %v305_v15 = vld [vmem:[#allocation2 + $0x888] sm:$0xff]  ;;  %v35_v16 = vld [vmem:[#allocation2 + $0x18] sm:$0xff] }
  0x6f   :  { %682 = vmatpush.msrb.mxu2 %v374_v17  ;;  %660 = vmatpush.msrb.mxu1 %v304_v18  ;;  %v140_v17 = vld [vmem:[#allocation2 + $0x360] sm:$0xff]  ;;  %v230_v18 = vld [vmem:[#allocation2 + $0x630] sm:$0xff] }
  0x70   :  { %692 = vmatpush.msrb.mxu3 %v105_v21  ;;  %643 = vmatpush.msrb.mxu0 %v209_v22  ;;  %v300_v21 = vld [vmem:[#allocation2 + $0x860] sm:$0xff]  ;;  %v385_v22 = vld [vmem:[#allocation2 + $0xb08] sm:$0xff] }
  0x71   :  { %683 = vmatpush.msrb.mxu2 %v369_v23  ;;  %661 = vmatpush.msrb.mxu1 %v299_v24  ;;  %v135_v23 = vld [vmem:[#allocation2 + $0x338] sm:$0xff]  ;;  %v225_v24 = vld [vmem:[#allocation2 + $0x608] sm:$0xff] }
  0x72   :  { %693 = vmatpush.msrb.mxu3 %v100_v26  ;;  %644 = vmatpush.msrb.mxu0 %v204_v27  ;;  %v295_v26 = vld [vmem:[#allocation2 + $0x838] sm:$0xff]  ;;  %v380_v27 = vld [vmem:[#allocation2 + $0xae0] sm:$0xff] }
  0x73   :  { %684 = vmatpush.msrb.mxu2 %v364_v28  ;;  %662 = vmatpush.msrb.mxu1 %v294_v29  ;;  %v130_v28 = vld [vmem:[#allocation2 + $0x310] sm:$0xff]  ;;  %v220_v29 = vld [vmem:[#allocation2 + $0x5e0] sm:$0xff] }
  0x74   :  { %694 = vmatpush.msrb.mxu3 %v95_v30  ;;  %645 = vmatpush.msrb.mxu0 %v199_v31  ;;  %v290_v30 = vld [vmem:[#allocation2 + $0x810] sm:$0xff]  ;;  %v375_v31 = vld [vmem:[#allocation2 + $0xab8] sm:$0xff] }
  0x75   :  { %685 = vmatpush.msrb.mxu2 %v359_v32  ;;  %663 = vmatpush.msrb.mxu1 %v289_v33  ;;  %v125_v32 = vld [vmem:[#allocation2 + $0x2e8] sm:$0xff]  ;;  %v215_v33 = vld [vmem:[#allocation2 + $0x5b8] sm:$0xff] }
  0x76   :  { %695 = vmatpush.msrb.mxu3 %v90_v34  ;;  %646 = vmatpush.msrb.mxu0 %v194_v35  ;;  %v285_v34 = vld [vmem:[#allocation2 + $0x7e8] sm:$0xff]  ;;  %v370_v35 = vld [vmem:[#allocation2 + $0xa90] sm:$0xff] }
  0x77   :  { %686 = vmatpush.msrb.mxu2 %v354_v36  ;;  %664 = vmatpush.msrb.mxu1 %v284_v37  ;;  %v120_v36 = vld [vmem:[#allocation2 + $0x2c0] sm:$0xff]  ;;  %v210_v37 = vld [vmem:[#allocation2 + $0x590] sm:$0xff] }
  0x78   :  { %696 = vmatpush.msrb.mxu3 %v85_v38  ;;  %711 = vmatpush.msra.mxu0 %v190_v40  ;;  %v280_v38 = vld [vmem:[#allocation2 + $0x7c0] sm:$0xff]  ;;  %v365_v40 = vld [vmem:[#allocation2 + $0xa68] sm:$0xff] }
  0x79   :  { %607 = vmatmul.f32.vlgmr.msra.gmra.mxu2 %v970_v19  ;;  %665 = vmatpush.msrb.mxu1 %v279_v42  ;;  %v205_v42 = vld [vmem:[#allocation2 + $0x568] sm:$0xff] }
  0x7a   :  { %751 = vmatpush.msra.mxu2 %v350_v41  ;;  %697 = vmatpush.msrb.mxu3 %v80_v43  ;;  %v115_v41 = vld [vmem:[#allocation2 + $0x298] sm:$0xff] }
  0x7b   :  { %712 = vmatpush.msra.mxu0 %v185_v44  ;;  %627 = vmatmul.f32.vlgmr.msra.gmra.mxu3 %v982_v25  ;;  %v275_v43 = vld [vmem:[#allocation2 + $0x798] sm:$0xff]  ;;  %v360_v44 = vld [vmem:[#allocation2 + $0xa40] sm:$0xff] }
  0x7c   :  { %752 = vmatpush.msra.mxu2 %v345_v45  ;;  %666 = vmatpush.msrb.mxu1 %v274_v46  ;;  %v111_v45 = vld [vmem:[#allocation2 + $0x278] sm:$0xff] }
  0x7d   :  { %698 = vmatpush.msrb.mxu3 %v75_v47  ;;  %713 = vmatpush.msra.mxu0 %v180_v48  ;;  %v271_v46 = vld [vmem:[#allocation2 + $0x778] sm:$0xff]  ;;  %v200_v47 = vld [vmem:[#allocation2 + $0x540] sm:$0xff] }
  0x7e   :  { %731 = vmatpush.msra.mxu1 %v270_v49  ;;  %753 = vmatpush.msra.mxu2 %v340_v50  ;;  %v355_v48 = vld [vmem:[#allocation2 + $0xa18] sm:$0xff]  ;;  %v106_v49 = vld [vmem:[#allocation2 + $0x250] sm:$0xff] }
  0x7f   :  { %699 = vmatpush.msrb.mxu3 %v70_v51  ;;  %714 = vmatpush.msra.mxu0 %v175_v52  ;;  %v266_v50 = vld [vmem:[#allocation2 + $0x750] sm:$0xff]  ;;  %v351_v51 = vld [vmem:[#allocation2 + $0x9f8] sm:$0xff] }
  0x80   :  { %732 = vmatpush.msra.mxu1 %v265_v53  ;;  %754 = vmatpush.msra.mxu2 %v335_v54  ;;  %v195_v52 = vld [vmem:[#allocation2 + $0x518] sm:$0xff]  ;;  %v101_v53 = vld [vmem:[#allocation2 + $0x228] sm:$0xff] }
  0x81   :  { %700 = vmatpush.msrb.mxu3 %v65_v55  ;;  %715 = vmatpush.msra.mxu0 %v170_v56  ;;  %v191_v54 = vld [vmem:[#allocation2 + $0x4f8] sm:$0xff]  ;;  %v261_v55 = vld [vmem:[#allocation2 + $0x728] sm:$0xff]  ;;  %v346_v56 = vld [vmem:[#allocation2 + $0x9d0] sm:$0xff] }
  0x82   :  { %903 = vmatmul.msk.f32.vlgmr.msrb.gmra.mxu2 %vm387_vm0, %v988_v39  ;;  %733 = vmatpush.msra.mxu1 %v260_v57  ;;  %v96_v57 = vld [vmem:[#allocation2 + $0x200] sm:$0xff] }
  0x83   :  { %755 = vmatpush.msra.mxu2 %v330_v58  ;;  %701 = vmatpush.msrb.mxu3 %v60_v59  ;;  %v186_v58 = vld [vmem:[#allocation2 + $0x4d0] sm:$0xff]  ;;  %v256_v59 = vld [vmem:[#allocation2 + $0x700] sm:$0xff] }
  0x84   :  { %716 = vmatpush.msra.mxu0 %v165_v60  ;;  %734 = vmatpush.msra.mxu1 %v255_v61  ;;  %v341_v60 = vld [vmem:[#allocation2 + $0x9a8] sm:$0xff]  ;;  %v91_v61 = vld [vmem:[#allocation2 + $0x1d8] sm:$0xff] }
  0x85   :  { %647 = vmatmul.f32.vlgmr.msrb.gmra.mxu0 %v964_v14  ;;  %756 = vmatpush.msra.mxu2 %v325_v62  ;;  %v181_v62 = vld [vmem:[#allocation2 + $0x4a8] sm:$0xff] }
  0x86   :  { %702 = vmatpush.msrb.mxu3 %v55_v63  ;;  %717 = vmatpush.msra.mxu0 %v160_v0  ;;  %v251_v63 = vld [vmem:[#allocation2 + $0x6d8] sm:$0xff]  ;;  %v86_v0 = vld [vmem:[#allocation2 + $0x1b0] sm:$0xff] }
  0x87   :  { %667 = vmatmul.f32.vlgmr.msrb.gmra.mxu1 %v975_v20  ;;  %757 = vmatpush.msra.mxu2 %v320_v2  ;;  %v246_v2 = vld [vmem:[#allocation2 + $0x6b0] sm:$0xff] }
  0x88   :  { %735 = vmatpush.msra.mxu1 %v250_v1  ;;  %703 = vmatpush.msrb.mxu3 %v50_v3  ;;  %v176_v1 = vld [vmem:[#allocation2 + $0x480] sm:$0xff]  ;;  %v331_v3 = vld [vmem:[#allocation2 + $0x958] sm:$0xff] }
  0x89   :  { %718 = vmatpush.msra.mxu0 %v155_v4  ;;  %758 = vmatpush.msra.mxu2 %v315_v6  ;;  %v81_v4 = vld [vmem:[#allocation2 + $0x188] sm:$0xff]  ;;  %v171_v6 = vld [vmem:[#allocation2 + $0x458] sm:$0xff] }
  0x8a   :  { %736 = vmatpush.msra.mxu1 %v245_v5  ;;  %704 = vmatpush.msrb.mxu3 %v45_v7  ;;  %v241_v5 = vld [vmem:[#allocation2 + $0x688] sm:$0xff]  ;;  %v326_v7 = vld [vmem:[#allocation2 + $0x930] sm:$0xff] }
  0x8b   :  { %719 = vmatpush.msra.mxu0 %v150_v8  ;;  %759 = vmatpush.msra.mxu2 %v310_v10  ;;  %v236_v8 = vld [vmem:[#allocation2 + $0x660] sm:$0xff]  ;;  %v321_v10 = vld [vmem:[#allocation2 + $0x908] sm:$0xff] }
  0x8c   :  { %737 = vmatpush.msra.mxu1 %v240_v9  ;;  %705 = vmatpush.msrb.mxu3 %v40_v11  ;;  %v166_v9 = vld [vmem:[#allocation2 + $0x430] sm:$0xff]  ;;  %v231_v11 = vld [vmem:[#allocation2 + $0x638] sm:$0xff] }
  0x8d   :  { %720 = vmatpush.msra.mxu0 %v145_v12  ;;  %760 = vmatpush.msra.mxu2 %v305_v15  ;;  %v316_v12 = vld [vmem:[#allocation2 + $0x8e0] sm:$0xff]  ;;  %v226_v15 = vld [vmem:[#allocation2 + $0x610] sm:$0xff] }
  0x8e   :  { %738 = vmatpush.msra.mxu1 %v235_v13  ;;  %706 = vmatpush.msrb.mxu3 %v35_v16  ;;  %v66_v13 = vld [vmem:[#allocation2 + $0x110] sm:$0xff]  ;;  %v156_v16 = vld [vmem:[#allocation2 + $0x3e0] sm:$0xff] }
  0x8f   :  { %721 = vmatpush.msra.mxu0 %v140_v17  ;;  %761 = vmatpush.msra.mxu2 %v300_v21  ;;  %v311_v17 = vld [vmem:[#allocation2 + $0x8b8] sm:$0xff]  ;;  %v221_v21 = vld [vmem:[#allocation2 + $0x5e8] sm:$0xff] }
  0x90   :  { %739 = vmatpush.msra.mxu1 %v230_v18  ;;  %780 = vmatpush.msra.mxu3 %v385_v22  ;;  %v61_v18 = vld [vmem:[#allocation2 + $0xe8] sm:$0xff]  ;;  %v151_v22 = vld [vmem:[#allocation2 + $0x3b8] sm:$0xff] }
  0x91   :  { %722 = vmatpush.msra.mxu0 %v135_v23  ;;  %762 = vmatpush.msra.mxu2 %v295_v26  ;;  %v306_v23 = vld [vmem:[#allocation2 + $0x890] sm:$0xff]  ;;  %v216_v26 = vld [vmem:[#allocation2 + $0x5c0] sm:$0xff] }
  0x92   :  { %740 = vmatpush.msra.mxu1 %v225_v24  ;;  %781 = vmatpush.msra.mxu3 %v380_v27  ;;  %v56_v24 = vld [vmem:[#allocation2 + $0xc0] sm:$0xff] }
  0x93   :  { %723 = vmatpush.msra.mxu0 %v130_v28  ;;  %763 = vmatpush.msra.mxu2 %v290_v30  ;;  %v301_v30 = vld [vmem:[#allocation2 + $0x868] sm:$0xff] }
  0x94   :  { %741 = vmatpush.msra.mxu1 %v220_v29  ;;  %782 = vmatpush.msra.mxu3 %v375_v31  ;;  %v146_v29 = vld [vmem:[#allocation2 + $0x390] sm:$0xff] }
  0x95   :  { %724 = vmatpush.msra.mxu0 %v125_v32  ;;  %764 = vmatpush.msra.mxu2 %v285_v34  ;;  %v51_v32 = vld [vmem:[#allocation2 + $0x98] sm:$0xff]  ;;  %v141_v34 = vld [vmem:[#allocation2 + $0x368] sm:$0xff] }
  0x96   :  { %742 = vmatpush.msra.mxu1 %v215_v33  ;;  %783 = vmatpush.msra.mxu3 %v370_v35  ;;  %v211_v33 = vld [vmem:[#allocation2 + $0x598] sm:$0xff]  ;;  %v296_v35 = vld [vmem:[#allocation2 + $0x840] sm:$0xff] }
  0x97   :  { %725 = vmatpush.msra.mxu0 %v120_v36  ;;  %765 = vmatpush.msra.mxu2 %v280_v38  ;;  %v46_v38 = vld [vmem:[#allocation2 + $0x70] sm:$0xff] }
  0x98   :  { %743 = vmatpush.msra.mxu1 %v210_v37  ;;  %784 = vmatpush.msra.mxu3 %v365_v40  ;;  %v206_v40 = vld [vmem:[#allocation2 + $0x570] sm:$0xff] }
  0x99   :  { %726 = vmatpush.msra.mxu0 %v115_v41  ;;  %766 = vmatpush.msra.mxu2 %v275_v43  ;;  %v136_v41 = vld [vmem:[#allocation2 + $0x340] sm:$0xff] }
  0x9a   :  { %744 = vmatpush.msra.mxu1 %v205_v42  ;;  %785 = vmatpush.msra.mxu3 %v360_v44  ;;  %v291_v42 = vld [vmem:[#allocation2 + $0x818] sm:$0xff]  ;;  %v41_v44 = vld [vmem:[#allocation2 + $0x48] sm:$0xff] }
  0x9b   :  { %791 = vmatpush.msrb.mxu0 %v111_v45  ;;  %831 = vmatpush.msrb.mxu2 %v271_v46  ;;  %v201_v45 = vld [vmem:[#allocation2 + $0x548] sm:$0xff]  ;;  %v131_v46 = vld [vmem:[#allocation2 + $0x318] sm:$0xff] }
  0x9c   :  { %745 = vmatpush.msra.mxu1 %v200_v47  ;;  %786 = vmatpush.msra.mxu3 %v355_v48  ;;  %v286_v47 = vld [vmem:[#allocation2 + $0x7f0] sm:$0xff] }
  0x9d   :  { %792 = vmatpush.msrb.mxu0 %v106_v49  ;;  %707 = vmatmul.f32.vlgmr.msrb.gmra.mxu3 %v970_v19  ;;  %v336_v19 = vld [vmem:[#allocation2 + $0x980] sm:$0xff] }
  0x9e   :  { %832 = vmatpush.msrb.mxu2 %v266_v50  ;;  %851 = vmatpush.msrb.mxu3 %v351_v51  ;;  %v36_v49 = vld [vmem:[#allocation2 + $0x20] sm:$0xff] }
  0x9f   :  { %746 = vmatpush.msra.mxu1 %v195_v52  ;;  %793 = vmatpush.msrb.mxu0 %v101_v53  ;;  %v196_v50 = vld [vmem:[#allocation2 + $0x520] sm:$0xff]  ;;  %v126_v52 = vld [vmem:[#allocation2 + $0x2f0] sm:$0xff]  ;;  %v281_v53 = vld [vmem:[#allocation2 + $0x7c8] sm:$0xff] }
  0xa0   :  { %833 = vmatpush.msrb.mxu2 %v261_v55  ;;  %852 = vmatpush.msrb.mxu3 %v346_v56  ;;  %v121_v55 = vld [vmem:[#allocation2 + $0x2c8] sm:$0xff]  ;;  %v276_v56 = vld [vmem:[#allocation2 + $0x7a0] sm:$0xff] }
  0xa1   :  { %811 = vmatpush.msrb.mxu1 %v191_v54  ;;  %794 = vmatpush.msrb.mxu0 %v96_v57  ;;  %v386_v54 = vld [vmem:[#allocation2 + $0xb10] sm:$0xff]  ;;  %v381_v57 = vld [vmem:[#allocation2 + $0xae8] sm:$0xff] }
  0xa2   :  { %834 = vmatpush.msrb.mxu2 %v256_v59  ;;  %853 = vmatpush.msrb.mxu3 %v341_v60  ;;  %v116_v59 = vld [vmem:[#allocation2 + $0x2a0] sm:$0xff] }
  0xa3   :  { %812 = vmatpush.msrb.mxu1 %v186_v58  ;;  %795 = vmatpush.msrb.mxu0 %v91_v61  ;;  %v909_v58 = vld [vmem:[%s1041_s0 + $0x10] sm:$0xff]  ;;  %v376_v60 = vld [vmem:[#allocation2 + $0xac0] sm:$0xff]  ;;  %v910_v61 = vld [vmem:[%s1041_s0 + $0x18] sm:$0xff] }
  0xa4   :  { %767 = vmatmul.f32.vlgmr.msra.gmra.mxu2 %v975_v20  ;;  %854 = vmatpush.msrb.mxu3 %v336_v19  ;;  %v76_v20 = vld [vmem:[#allocation2 + $0x160] sm:$0xff]  ;;  %v912_v19 = vld [vmem:[%s1041_s0 + $0x8] sm:$0xff] }
  0xa5   :  { %813 = vmatpush.msrb.mxu1 %v181_v62  ;;  %835 = vmatpush.msrb.mxu2 %v251_v63  ;;  %v911_v62 = vld [vmem:[%s1041_s0] sm:$0xff]  ;;  %v371_v63 = vld [vmem:[#allocation2 + $0xa98] sm:$0xff] }
  0xa6   :  { %796 = vmatpush.msrb.mxu0 %v86_v0  ;;  %904 = vmatmul.msk.f32.vlgmr.msra.gmra.mxu3 %vm387_vm0, %v988_v39  ;;  %v161_v39 = vld [vmem:[#allocation2 + $0x408] sm:$0xff]  ;;  %v366_v0 = vld [vmem:[#allocation2 + $0xa70] sm:$0xff] }
  0xa7   :  { %727 = vmatmul.f32.vlgmr.msra.gmra.mxu0 %v982_v25  ;;  %814 = vmatpush.msrb.mxu1 %v176_v1  ;;  %v71_v25 = vld [vmem:[#allocation2 + $0x138] sm:$0xff]  ;;  %v361_v1 = vld [vmem:[#allocation2 + $0xa48] sm:$0xff] }
  0xa8   :  { %836 = vmatpush.msrb.mxu2 %v246_v2  ;;  %855 = vmatpush.msrb.mxu3 %v331_v3  ;;  %v356_v2 = vld [vmem:[#allocation2 + $0xa20] sm:$0xff] }
  0xa9   :  { %797 = vmatpush.msrb.mxu0 %v81_v4  ;;  %747 = vmatmul.f32.vlgmr.msra.gmra.mxu1 %v964_v14  ;;  %v913_v3 = vld [vmem:[%s1041_s0 + $0x20] sm:$0xff] }
  0xaa   :  { %837 = vmatpush.msrb.mxu2 %v241_v5  ;;  %815 = vmatpush.msrb.mxu1 %v171_v6 }
  0xab   :  { %856 = vmatpush.msrb.mxu3 %v326_v7  ;;  %798 = vmatpush.msrb.mxu0 %v76_v20 }
  0xac   :  { %838 = vmatpush.msrb.mxu2 %v236_v8  ;;  %816 = vmatpush.msrb.mxu1 %v166_v9 }
  0xad   :  { %857 = vmatpush.msrb.mxu3 %v321_v10  ;;  %799 = vmatpush.msrb.mxu0 %v71_v25 }
  0xae   :  { %839 = vmatpush.msrb.mxu2 %v231_v11  ;;  %v408_v14 = vpop.f32.mrf.mxu0  ;;  %817 = vmatpush.msrb.mxu1 %v161_v39 }
  0xaf   :  { %858 = vmatpush.msrb.mxu3 %v316_v12  ;;  %800 = vmatpush.msrb.mxu0 %v66_v13 }
  0xb0   :  { %840 = vmatpush.msrb.mxu2 %v226_v15  ;;  %818 = vmatpush.msrb.mxu1 %v156_v16  ;;  %v428_v27 = vpop.f32.mrf.mxu1 }
  0xb1   :  { %859 = vmatpush.msrb.mxu3 %v311_v17  ;;  %v448_v28 = vpop.f32.mrf.mxu2  ;;  %801 = vmatpush.msrb.mxu0 %v61_v18  ;;  %v429_v31 = vadd.f32 %v428_v27, %v408_v14 }
  0xb2   :  { %841 = vmatpush.msrb.mxu2 %v221_v21  ;;  %819 = vmatpush.msrb.mxu1 %v151_v22 }
  0xb3   :  { %860 = vmatpush.msrb.mxu3 %v306_v23  ;;  %802 = vmatpush.msrb.mxu0 %v56_v24  ;;  %v449_v36 = vadd.f32 %v448_v28, %v429_v31  ;;  %v468_v37 = vpop.f32.mrf.mxu3 }
  0xb4   :  { %842 = vmatpush.msrb.mxu2 %v216_v26  ;;  %820 = vmatpush.msrb.mxu1 %v146_v29 }
  0xb5   :  { %861 = vmatpush.msrb.mxu3 %v301_v30  ;;  %803 = vmatpush.msrb.mxu0 %v51_v32  ;;  %v469_v43 = vadd.f32 %v468_v37, %v449_v36 }
  0xb6   :  { %843 = vmatpush.msrb.mxu2 %v211_v33  ;;  %821 = vmatpush.msrb.mxu1 %v141_v34 }
  0xb7   :  { %862 = vmatpush.msrb.mxu3 %v296_v35  ;;  %804 = vmatpush.msrb.mxu0 %v46_v38  ;;  %v488_v48 = vpop.f32.mrf.mxu0 }
  0xb8   :  { %844 = vmatpush.msrb.mxu2 %v206_v40  ;;  %822 = vmatpush.msrb.mxu1 %v136_v41  ;;  %v489_v51 = vadd.f32 %v488_v48, %v469_v43 }
  0xb9   :  { %863 = vmatpush.msrb.mxu3 %v291_v42  ;;  %805 = vmatpush.msrb.mxu0 %v41_v44 }
  0xba   :  { %845 = vmatpush.msrb.mxu2 %v201_v45  ;;  %823 = vmatpush.msrb.mxu1 %v131_v46  ;;  %891 = vst [vmem:[%s1043_s2] sm:$0xff] %v489_v51 }
  0xbb   :  { %864 = vmatpush.msrb.mxu3 %v286_v47  ;;  %806 = vmatpush.msrb.mxu0 %v36_v49 }
  0xbc   :  { %846 = vmatpush.msrb.mxu2 %v196_v50  ;;  %824 = vmatpush.msrb.mxu1 %v126_v52 }
  0xbd   :  { %865 = vmatpush.msrb.mxu3 %v281_v53  ;;  %880 = vmatpush.msra.mxu0 %v386_v54 }
  0xbe   :  { %847 = vmatmul.f32.vlgmr.msrb.gmra.mxu2 %v909_v58  ;;  %825 = vmatpush.msrb.mxu1 %v121_v55 }
  0xbf   :  { %866 = vmatpush.msrb.mxu3 %v276_v56  ;;  %881 = vmatpush.msra.mxu0 %v381_v57 }
  0xc0   :  { %867 = vmatmul.f32.vlgmr.msrb.gmra.mxu3 %v910_v61  ;;  %826 = vmatpush.msrb.mxu1 %v116_v59 }
  0xc1   :  { %807 = vmatmul.f32.vlgmr.msrb.gmra.mxu0 %v911_v62  ;;  %827 = vmatmul.f32.vlgmr.msrb.gmra.mxu1 %v912_v19 }
  0xc2   :  { %882 = vmatpush.msra.mxu0 %v376_v60 }
  0xc4   :  { %883 = vmatpush.msra.mxu0 %v371_v63 }
  0xc6   :  { %884 = vmatpush.msra.mxu0 %v366_v0 }
  0xc8   :  { %885 = vmatpush.msra.mxu0 %v361_v1 }
  0xca   :  { %886 = vmatpush.msra.mxu0 %v356_v2 }
  0xcb   :  { %905 = vmatmul.msk.f32.vlgmr.msra.gmra.mxu0 %vm387_vm0, %v913_v3 }
  0xd8   :  { %v508_v4 = vpop.f32.mrf.mxu1 }
  0xd9   :  { %v528_v5 = vpop.f32.mrf.mxu2 }
  0xda   :  { %v529_v6 = vadd.f32 %v528_v5, %v508_v4 }
  0xdc   :  { %v548_v7 = vpop.f32.mrf.mxu3 }
  0xdd   :  { %v549_v20 = vadd.f32 %v548_v7, %v529_v6 }
  0xdf   :  { %v568_v8 = vpop.f32.mrf.mxu0 }
  0xe0   :  { %v569_v9 = vadd.f32 %v568_v8, %v549_v20 }
  0xe1   :  { %v588_v10 = vpop.f32.mrf.mxu1 }
  0xe2   :  { %v589_v25 = vadd.f32 %v588_v10, %v569_v9 }
  0xe4   :  { %892 = vst [vmem:[%s1043_s2 + $0x8] sm:$0xff] %v589_v25 }
  0xfc   :  { %v608_v11 = vpop.f32.mrf.mxu2 }
  0xfe   :  { %v628_v39 = vpop.f32.mrf.mxu3 }
  0xff   :  { %v629_v12 = vadd.f32 %v628_v39, %v608_v11 }
 0x102   :  { %v648_v13 = vpop.f32.mrf.mxu0 }
 0x103   :  { %v649_v15 = vadd.f32 %v648_v13, %v629_v12 }
 0x104   :  { %v668_v16 = vpop.f32.mrf.mxu1 }
 0x105   :  { %v669_v17 = vadd.f32 %v668_v16, %v649_v15  ;;  %v688_v14 = vpop.f32.mrf.mxu2 }
 0x107   :  { %v689_v18 = vadd.f32 %v688_v14, %v669_v17 }
 0x109   :  { %893 = vst [vmem:[%s1043_s2 + $0x10] sm:$0xff] %v689_v18 }
 0x120   :  { %v708_v21 = vpop.f32.mrf.mxu3 }
 0x124   :  { %v728_v22 = vpop.f32.mrf.mxu0 }
 0x125   :  { %v729_v23 = vadd.f32 %v728_v22, %v708_v21 }
 0x126   :  { %v748_v24 = vpop.f32.mrf.mxu1 }
 0x127   :  { %v768_v26 = vpop.f32.mrf.mxu2  ;;  %v749_v27 = vadd.f32 %v748_v24, %v729_v23 }
 0x129   :  { %v769_v28 = vadd.f32 %v768_v26, %v749_v27  ;;  %v788_v29 = vpop.f32.mrf.mxu3 }
 0x12b   :  { %v789_v30 = vadd.f32 %v788_v29, %v769_v28 }
 0x12d   :  { %894 = vst [vmem:[%s1043_s2 + $0x18] sm:$0xff] %v789_v30 }
 0x13e   :  { %v808_v31 = vpop.f32.mrf.mxu0  ;;  %v828_v32 = vpop.f32.mrf.mxu1 }
 0x13f   :  { %v829_v33 = vadd.f32 %v828_v32, %v808_v31 }
 0x141   :  { %v848_v34 = vpop.f32.mrf.mxu2 }
 0x142   :  { %v849_v35 = vadd.f32 %v848_v34, %v829_v33 }
 0x143   :  { %v868_v36 = vpop.f32.mrf.mxu3 }
 0x144   :  { %v869_v37 = vadd.f32 %v868_v36, %v849_v35 }
 0x148   :  { %v888_v38 = vpop.f32.mrf.mxu0 }
 0x149   :  { %v889_v40 = vadd.f32 %v888_v38, %v869_v37 }
 0x14b   :  { %895 = vst [vmem:[%s1043_s2 + $0x20] sm:$0xff] %v889_v40 }
 0x14c   :  { %900 = vsyncpa [#allocation3], 1 }

</bundles_post_ra>
